<compile_context>
chip_gen: v7x
topology: tpu7x:2x2x1
jax: 0.10.0
libtpu: 0.0.40
codegen_flags: <defaults>
</compile_context>

<pallas_src>
import functools

import jax
import jax.numpy as jnp
from jax import lax
from jax.experimental import pallas as pl
from jax.experimental.pallas import tpu as pltpu


# ----------------------------- fused Pallas kernel ---------------------------

def _make_block_kernel(H, W, Cin, GW, Cout, stride, has_projection, compute_dtype):
    """Whole bottleneck block for one image per grid step."""
    Ho = (H + 2 - 3) // stride + 1
    Wo = (W + 2 - 3) // stride + 1

    def kernel(*refs):
        if has_projection:
            (x_ref, w1_ref, b1_ref, w2_ref, b2_ref, w3_ref, b3_ref,
             ws_ref, bs_ref, o_ref, pad_ref) = refs
        else:
            (x_ref, w1_ref, b1_ref, w2_ref, b2_ref, w3_ref, b3_ref,
             o_ref, pad_ref) = refs

        x = x_ref[0]                                            # (H, W, Cin)

        # ---- conv1 (1x1) + bn1 + relu : plain matmul on the pixel slab ----
        x2d = x.reshape(H * W, Cin).astype(compute_dtype)
        h1 = jnp.dot(x2d, w1_ref[...], preferred_element_type=jnp.float32)
        h1 = jnp.maximum(h1 + b1_ref[...], 0.0)                 # (H*W, GW) f32

        # ---- zero-padded halo in VMEM for the 3x3 conv (no HBM im2col) ----
        pad_ref[...] = jnp.zeros_like(pad_ref)
        pad_ref[1:H + 1, 1:W + 1, :] = h1.reshape(H, W, GW)
        padded = pad_ref[...]                                   # (H+2, W+2, GW) f32

        # ---- conv2 (3x3 grouped, stride) + bn2 + relu : 9 shifted matmuls ----
        # TODO(synk): the per-tap weight is dense block-diagonal, so the MXU does
        # cardinality x extra FLOPs; acceptable at small cardinality — restructure
        # as a grouped contraction for ResNeXt-scale cardinality (e.g. 32).
        acc = jnp.zeros((Ho * Wo, GW), jnp.float32)
        for ky in range(3):
            for kx in range(3):
                win = padded[ky:ky + stride * (Ho - 1) + 1:stride,
                             kx:kx + stride * (Wo - 1) + 1:stride, :]
                lhs = win.reshape(Ho * Wo, GW).astype(compute_dtype)
                acc = acc + jnp.dot(lhs, w2_ref[ky * 3 + kx],
                                    preferred_element_type=jnp.float32)
        h2 = jnp.maximum(acc + b2_ref[...], 0.0).astype(compute_dtype)

        # ---- conv3 (1x1) + bn3 ----
        y = jnp.dot(h2, w3_ref[...], preferred_element_type=jnp.float32) + b3_ref[...]

        # ---- shortcut ----
        if has_projection:
            xs = x[0:stride * (Ho - 1) + 1:stride, 0:stride * (Wo - 1) + 1:stride, :]
            sc = jnp.dot(xs.reshape(Ho * Wo, Cin).astype(compute_dtype), ws_ref[...],
                         preferred_element_type=jnp.float32) + bs_ref[...]
        else:
            # identity shortcut (module guarantees stride == 1 and Cin == Cout here)
            sc = x.reshape(Ho * Wo, Cout).astype(jnp.float32)

        # ---- residual add + relu ----
        # NOTE: Cout < 128 at these toy shapes makes the output lane-sparse; real
        # ResNeXt blocks (Cout >= 256) get lane-dense stores for free.
        o_ref[0] = jnp.maximum(y + sc, 0.0).reshape(Ho, Wo, Cout).astype(o_ref.dtype)

    return kernel, Ho, Wo


# --------------------- one-time parameter preparation -------------------------

def _fold_bn(gamma, beta, mean, var, eps):
    scale = gamma / jnp.sqrt(var + eps)
    shift = beta - mean * scale
    return scale, shift


def _grouped3x3_to_dense_taps(w2_pt, cardinality):
    """(GW, GW//card, 3, 3) grouped OIHW weight -> (9, GW, GW) per-tap block-diag."""
    GW, bw, _, _ = w2_pt.shape
    per = GW // cardinality
    wg = w2_pt.reshape(cardinality, per, bw, 3, 3)        # (g, oc, ic, ky, kx)
    wt = jnp.transpose(wg, (3, 4, 0, 2, 1))               # (ky, kx, g, ic, oc)
    dense = jnp.zeros((3, 3, GW, GW), w2_pt.dtype)        # (ky, kx, in, out)
    for g in range(cardinality):
        dense = dense.at[:, :, g * bw:(g + 1) * bw, g * per:(g + 1) * per].set(wt[:, :, g])
    return dense.reshape(9, GW, GW)


def prepare_block_params(params, cardinality, compute_dtype=jnp.bfloat16, eps=1e-5):
    """One-time prep: transpose weights to (in, out), fold BN scale into weight
    columns (shift stays a f32 bias), build per-tap dense 3x3 weights, cast matmul
    operands to the MXU compute dtype."""
    GW = params["w1"].shape[0]
    Cout = params["w3"].shape[0]

    def bn(sfx, C):
        return _fold_bn(params["g" + sfx], params["b" + sfx],
                        params.get("m" + sfx, jnp.zeros((C,), jnp.float32)),
                        params.get("v" + sfx, jnp.ones((C,), jnp.float32)), eps)

    s1, t1 = bn("1", GW)
    s2, t2 = bn("2", GW)
    s3, t3 = bn("3", Cout)

    w1 = jnp.transpose(params["w1"][:, :, 0, 0], (1, 0)) * s1[None, :]
    w2 = _grouped3x3_to_dense_taps(params["w2"], cardinality) * s2[None, None, :]
    w3 = jnp.transpose(params["w3"][:, :, 0, 0], (1, 0)) * s3[None, :]

    prepped = {
        "w1": w1.astype(compute_dtype), "b1": t1.reshape(1, -1).astype(jnp.float32),
        "w2": w2.astype(compute_dtype), "b2": t2.reshape(1, -1).astype(jnp.float32),
        "w3": w3.astype(compute_dtype), "b3": t3.reshape(1, -1).astype(jnp.float32),
    }
    if "ws" in params:
        ss, ts = _fold_bn(params["gs"], params["bs"],
                          params.get("ms", jnp.zeros((Cout,), jnp.float32)),
                          params.get("vs", jnp.ones((Cout,), jnp.float32)), eps)
        ws = jnp.transpose(params["ws"][:, :, 0, 0], (1, 0)) * ss[None, :]
        prepped["ws"] = ws.astype(compute_dtype)
        prepped["bs"] = ts.reshape(1, -1).astype(jnp.float32)
    return prepped


# ----------------------------- forward (single pallas_call) -------------------

@functools.partial(jax.jit, static_argnames=("stride", "compute_dtype"))
def block_forward_pallas(x_nchw, prepped, *, stride, compute_dtype=jnp.bfloat16):
    N, Cin, H, W = x_nchw.shape
    GW = prepped["w1"].shape[1]
    Cout = prepped["w3"].shape[1]
    has_projection = "ws" in prepped
    if not has_projection:
        assert stride == 1 and Cin == Cout, (
            "identity shortcut requires stride == 1 and in_planes == expansion*group_width")

    kernel, Ho, Wo = _make_block_kernel(H, W, Cin, GW, Cout, stride,
                                        has_projection, compute_dtype)

    # NHWC pixel-major layout: channels on the lane axis, pixels on sublanes.
    x_nhwc = jnp.transpose(x_nchw, (0, 2, 3, 1)).astype(compute_dtype)

    in_specs = [
        pl.BlockSpec((1, H, W, Cin), lambda n: (n, 0, 0, 0)),   # streamed per image
        pl.BlockSpec((Cin, GW), lambda n: (0, 0)),              # grid-invariant weights
        pl.BlockSpec((1, GW), lambda n: (0, 0)),
        pl.BlockSpec((9, GW, GW), lambda n: (0, 0, 0)),
        pl.BlockSpec((1, GW), lambda n: (0, 0)),
        pl.BlockSpec((GW, Cout), lambda n: (0, 0)),
        pl.BlockSpec((1, Cout), lambda n: (0, 0)),
    ]
    args = [x_nhwc, prepped["w1"], prepped["b1"], prepped["w2"], prepped["b2"],
            prepped["w3"], prepped["b3"]]
    if has_projection:
        in_specs += [pl.BlockSpec((Cin, Cout), lambda n: (0, 0)),
                     pl.BlockSpec((1, Cout), lambda n: (0, 0))]
        args += [prepped["ws"], prepped["bs"]]

    # Explicit VMEM budget: double-buffered streamed blocks + resident weights +
    # padded scratch, with headroom; capped well below v7x's 64 MiB physical VMEM.
    csize = jnp.dtype(compute_dtype).itemsize
    weight_bytes = sum(int(a.size) * jnp.dtype(a.dtype).itemsize for a in args[1:])
    block_bytes = H * W * Cin * csize + Ho * Wo * Cout * 4
    scratch_bytes = (H + 2) * (W + 2) * GW * 4
    vmem_limit = int(min(max(4 * (2 * block_bytes + weight_bytes + scratch_bytes),
                             8 << 20), 48 << 20))

    out_nhwc = pl.pallas_call(
        kernel,
        out_shape=jax.ShapeDtypeStruct((N, Ho, Wo, Cout), jnp.float32),
        grid_spec=pltpu.PrefetchScalarGridSpec(
            num_scalar_prefetch=0,
            grid=(N,),                      # one image per step; N >= 2 keeps both
                                            # v7x TensorCores busy via "parallel"
            in_specs=in_specs,
            out_specs=pl.BlockSpec((1, Ho, Wo, Cout), lambda n: (n, 0, 0, 0)),
            scratch_shapes=[pltpu.VMEM((H + 2, W + 2, GW), jnp.float32)],
        ),
        compiler_params=pltpu.CompilerParams(
            dimension_semantics=("parallel",),
            vmem_limit_bytes=vmem_limit),
    )(*args)

    return jnp.transpose(out_nhwc, (0, 3, 1, 2))                # back to NCHW


# ----------------------------- pure-JAX reference -----------------------------

def block_forward_reference(x, p, cardinality, stride, eps=1e-5):
    def conv(x, w, s=1, groups=1, pad=0):
        return lax.conv_general_dilated(
            x, w, window_strides=(s, s), padding=[(pad, pad), (pad, pad)],
            feature_group_count=groups,
            dimension_numbers=("NCHW", "OIHW", "NCHW"))

    def bn(x, g, b, m, v):
        scale = g / jnp.sqrt(v + eps)
        shift = b - m * scale
        return x * scale[None, :, None, None] + shift[None, :, None, None]

    out = jax.nn.relu(bn(conv(x, p["w1"]), p["g1"], p["b1"], p["m1"], p["v1"]))
    out = jax.nn.relu(bn(conv(out, p["w2"], s=stride, groups=cardinality, pad=1),
                         p["g2"], p["b2"], p["m2"], p["v2"]))
    out = bn(conv(out, p["w3"]), p["g3"], p["b3"], p["m3"], p["v3"])
    if "ws" in p:
        sc = bn(conv(x, p["ws"], s=stride), p["gs"], p["bs"], p["ms"], p["vs"])
    else:
        sc = x
    return jax.nn.relu(out + sc)


# ----------------------------- main -------------------------------------------

def _make_params(key, Cin, cardinality, bottleneck_width, stride):
    GW = cardinality * bottleneck_width
    Cout = 2 * GW                     # expansion = 2
    ks = jax.random.split(key, 24)

    def bn_stats(i, C):
        return (1.0 + 0.1 * jax.random.normal(ks[i], (C,)),       # gamma
                0.05 * jax.random.normal(ks[i + 1], (C,)),         # beta
                0.1 * jax.random.normal(ks[i + 2], (C,)),          # running_mean
                0.5 + jax.random.uniform(ks[i + 3], (C,)))         # running_var

    p = {"w1": 0.1 * jax.random.normal(ks[0], (GW, Cin, 1, 1))}
    p["g1"], p["b1"], p["m1"], p["v1"] = bn_stats(1, GW)
    p["w2"] = 0.1 * jax.random.normal(ks[5], (GW, GW // cardinality, 3, 3))
    p["g2"], p["b2"], p["m2"], p["v2"] = bn_stats(6, GW)
    p["w3"] = 0.1 * jax.random.normal(ks[10], (Cout, GW, 1, 1))
    p["g3"], p["b3"], p["m3"], p["v3"] = bn_stats(11, Cout)
    if stride != 1 or Cin != Cout:                                 # projection shortcut
        p["ws"] = 0.1 * jax.random.normal(ks[15], (Cout, Cin, 1, 1))
        p["gs"], p["bs"], p["ms"], p["vs"] = bn_stats(16, Cout)
    return p, GW, Cout


if __name__ == "__main__":
    key = jax.random.PRNGKey(0)
    configs = [
        # (N, Cin, H, W, cardinality, bottleneck_width, stride)
        (2, 8, 8, 8, 4, 4, 1),     # projection shortcut (Cin != expansion*group_width)
        (2, 32, 8, 8, 4, 4, 1),    # identity shortcut   (Cin == expansion*group_width)
    ]
    for idx, (N, Cin, H, W, card, bw, stride) in enumerate(configs):
        kp, kx = jax.random.split(jax.random.fold_in(key, idx))
        params, GW, Cout = _make_params(kp, Cin, card, bw, stride)
        x = jax.random.normal(kx, (N, Cin, H, W), jnp.float32)

        prepped = prepare_block_params(params, card)               # one-time weight prep
        out = jax.block_until_ready(block_forward_pallas(x, prepped, stride=stride))
        ref = jax.block_until_ready(block_forward_reference(x, params, card, stride))

        assert out.shape == ref.shape, (out.shape, ref.shape)
        max_err = float(jnp.max(jnp.abs(out - ref)))
        # bf16 matmul operands with f32 accumulation -> ~1e-2 relative tolerance.
        assert jnp.allclose(out, ref, atol=2e-2, rtol=2e-2), (idx, max_err)

    print("KERNEL_OK")
</pallas_src>

<mosaic_0001>
module attributes {stable_mosaic.version = 11 : i64} {
  func.func @kernel(%arg0: i32, %arg1: memref<1x8x8x8xbf16, #tpu.memory_space<vmem>>, %arg2: memref<8x16xbf16, #tpu.memory_space<vmem>>, %arg3: memref<1x16xf32, #tpu.memory_space<vmem>>, %arg4: memref<9x16x16xbf16, #tpu.memory_space<vmem>>, %arg5: memref<1x16xf32, #tpu.memory_space<vmem>>, %arg6: memref<16x32xbf16, #tpu.memory_space<vmem>>, %arg7: memref<1x32xf32, #tpu.memory_space<vmem>>, %arg8: memref<8x32xbf16, #tpu.memory_space<vmem>>, %arg9: memref<1x32xf32, #tpu.memory_space<vmem>>, %arg10: memref<1x8x8x32xf32, #tpu.memory_space<vmem>>, %arg11: memref<10x10x16xf32, #tpu.memory_space<vmem>>) attributes {dimension_semantics = [#tpu.dimension_semantics<parallel>], iteration_bounds = array<i64: 2>, scalar_prefetch = 0 : i64, scratch_operands = 1 : i64, tpu.core_type = #tpu.core_type<tc>, window_params = [{transform_indices = @transform_0, window_bounds = array<i64: 1, 8, 8, 8>}, {pipeline_mode = #tpu.pipeline_mode<synchronous>, transform_indices = @transform_1, window_bounds = array<i64: 8, 16>}, {pipeline_mode = #tpu.pipeline_mode<synchronous>, transform_indices = @transform_2, window_bounds = array<i64: 1, 16>}, {pipeline_mode = #tpu.pipeline_mode<synchronous>, transform_indices = @transform_3, window_bounds = array<i64: 9, 16, 16>}, {pipeline_mode = #tpu.pipeline_mode<synchronous>, transform_indices = @transform_4, window_bounds = array<i64: 1, 16>}, {pipeline_mode = #tpu.pipeline_mode<synchronous>, transform_indices = @transform_5, window_bounds = array<i64: 16, 32>}, {pipeline_mode = #tpu.pipeline_mode<synchronous>, transform_indices = @transform_6, window_bounds = array<i64: 1, 32>}, {pipeline_mode = #tpu.pipeline_mode<synchronous>, transform_indices = @transform_7, window_bounds = array<i64: 8, 32>}, {pipeline_mode = #tpu.pipeline_mode<synchronous>, transform_indices = @transform_8, window_bounds = array<i64: 1, 32>}, {transform_indices = @transform_9, window_bounds = array<i64: 1, 8, 8, 32>}]} {
    %c0 = arith.constant 0 : index
    %c0_0 = arith.constant 0 : index
    %c0_1 = arith.constant 0 : index
    %c0_2 = arith.constant 0 : index
    %0 = vector.load %arg1[%c0, %c0_0, %c0_1, %c0_2] : memref<1x8x8x8xbf16, #tpu.memory_space<vmem>>, vector<1x8x8x8xbf16>
    %1 = vector.shape_cast %0 : vector<1x8x8x8xbf16> to vector<8x8x8xbf16>
    %2 = vector.shape_cast %1 : vector<8x8x8xbf16> to vector<64x8xbf16>
    %c0_3 = arith.constant 0 : index
    %c0_4 = arith.constant 0 : index
    %3 = vector.load %arg2[%c0_3, %c0_4] : memref<8x16xbf16, #tpu.memory_space<vmem>>, vector<8x16xbf16>
    %cst = arith.constant dense<0.000000e+00> : vector<64x16xf32>
    %4 = tpu.matmul %2, %3, %cst {dimension_numbers = #tpu.dot_dimension_numbers<[1], [0], [0], [1], [0, 0, 1, 1], [], []>} : vector<64x8xbf16>, vector<8x16xbf16>, vector<64x16xf32> -> vector<64x16xf32>
    %c0_5 = arith.constant 0 : index
    %c0_6 = arith.constant 0 : index
    %5 = vector.load %arg3[%c0_5, %c0_6] : memref<1x16xf32, #tpu.memory_space<vmem>>, vector<1x16xf32>
    %6 = vector.broadcast %5 : vector<1x16xf32> to vector<64x16xf32>
    %7 = arith.addf %4, %6 : vector<64x16xf32>
    %cst_7 = arith.constant 0.000000e+00 : f32
    %8 = vector.broadcast %cst_7 : f32 to vector<64x16xf32>
    %9 = arith.maximumf %7, %8 : vector<64x16xf32>
    %cst_8 = arith.constant 0.000000e+00 : f32
    %10 = vector.broadcast %cst_8 : f32 to vector<10x10x16xf32>
    %c0_9 = arith.constant 0 : index
    %c0_10 = arith.constant 0 : index
    %c0_11 = arith.constant 0 : index
    %11 = vector.load %arg11[%c0_9, %c0_10, %c0_11] : memref<10x10x16xf32, #tpu.memory_space<vmem>>, vector<10x10x16xf32>
    tpu.vector_store %arg11[%c0_9, %c0_10, %c0_11], %10 {strides = array<i32>} : memref<10x10x16xf32, #tpu.memory_space<vmem>>, vector<10x10x16xf32>,
    %12 = vector.shape_cast %9 : vector<64x16xf32> to vector<8x8x16xf32>
    %c1 = arith.constant 1 : index
    %c1_12 = arith.constant 1 : index
    %c0_13 = arith.constant 0 : index
    %13 = vector.load %arg11[%c1, %c1_12, %c0_13] : memref<10x10x16xf32, #tpu.memory_space<vmem>>, vector<8x8x16xf32>
    tpu.vector_store %arg11[%c1, %c1_12, %c0_13], %12 {strides = array<i32>} : memref<10x10x16xf32, #tpu.memory_space<vmem>>, vector<8x8x16xf32>,
    %c0_14 = arith.constant 0 : index
    %c0_15 = arith.constant 0 : index
    %c0_16 = arith.constant 0 : index
    %14 = vector.load %arg11[%c0_14, %c0_15, %c0_16] : memref<10x10x16xf32, #tpu.memory_space<vmem>>, vector<10x10x16xf32>
    %cst_17 = arith.constant 0.000000e+00 : f32
    %15 = vector.broadcast %cst_17 : f32 to vector<64x16xf32>
    %16 = vector.extract_strided_slice %14 {offsets = [0, 0, 0], sizes = [8, 8, 16], strides = [1, 1, 1]} : vector<10x10x16xf32> to vector<8x8x16xf32>
    %17 = vector.shape_cast %16 : vector<8x8x16xf32> to vector<64x16xf32>
    %18 = arith.truncf %17 : vector<64x16xf32> to vector<64x16xbf16>
    %c0_18 = arith.constant 0 : index
    %c0_19 = arith.constant 0 : index
    %c0_20 = arith.constant 0 : index
    %19 = vector.load %arg4[%c0_18, %c0_19, %c0_20] : memref<9x16x16xbf16, #tpu.memory_space<vmem>>, vector<1x16x16xbf16>
    %20 = vector.shape_cast %19 : vector<1x16x16xbf16> to vector<16x16xbf16>
    %cst_21 = arith.constant dense<0.000000e+00> : vector<64x16xf32>
    %21 = tpu.matmul %18, %20, %cst_21 {dimension_numbers = #tpu.dot_dimension_numbers<[1], [0], [0], [1], [0, 0, 1, 1], [], []>} : vector<64x16xbf16>, vector<16x16xbf16>, vector<64x16xf32> -> vector<64x16xf32>
    %22 = arith.addf %15, %21 : vector<64x16xf32>
    %23 = vector.extract_strided_slice %14 {offsets = [0, 1, 0], sizes = [8, 8, 16], strides = [1, 1, 1]} : vector<10x10x16xf32> to vector<8x8x16xf32>
    %24 = vector.shape_cast %23 : vector<8x8x16xf32> to vector<64x16xf32>
    %25 = arith.truncf %24 : vector<64x16xf32> to vector<64x16xbf16>
    %c1_22 = arith.constant 1 : index
    %c0_23 = arith.constant 0 : index
    %c0_24 = arith.constant 0 : index
    %26 = vector.load %arg4[%c1_22, %c0_23, %c0_24] : memref<9x16x16xbf16, #tpu.memory_space<vmem>>, vector<1x16x16xbf16>
    %27 = vector.shape_cast %26 : vector<1x16x16xbf16> to vector<16x16xbf16>
    %cst_25 = arith.constant dense<0.000000e+00> : vector<64x16xf32>
    %28 = tpu.matmul %25, %27, %cst_25 {dimension_numbers = #tpu.dot_dimension_numbers<[1], [0], [0], [1], [0, 0, 1, 1], [], []>} : vector<64x16xbf16>, vector<16x16xbf16>, vector<64x16xf32> -> vector<64x16xf32>
    %29 = arith.addf %22, %28 : vector<64x16xf32>
    %30 = vector.extract_strided_slice %14 {offsets = [0, 2, 0], sizes = [8, 8, 16], strides = [1, 1, 1]} : vector<10x10x16xf32> to vector<8x8x16xf32>
    %31 = vector.shape_cast %30 : vector<8x8x16xf32> to vector<64x16xf32>
    %32 = arith.truncf %31 : vector<64x16xf32> to vector<64x16xbf16>
    %c2 = arith.constant 2 : index
    %c0_26 = arith.constant 0 : index
    %c0_27 = arith.constant 0 : index
    %33 = vector.load %arg4[%c2, %c0_26, %c0_27] : memref<9x16x16xbf16, #tpu.memory_space<vmem>>, vector<1x16x16xbf16>
    %34 = vector.shape_cast %33 : vector<1x16x16xbf16> to vector<16x16xbf16>
    %cst_28 = arith.constant dense<0.000000e+00> : vector<64x16xf32>
    %35 = tpu.matmul %32, %34, %cst_28 {dimension_numbers = #tpu.dot_dimension_numbers<[1], [0], [0], [1], [0, 0, 1, 1], [], []>} : vector<64x16xbf16>, vector<16x16xbf16>, vector<64x16xf32> -> vector<64x16xf32>
    %36 = arith.addf %29, %35 : vector<64x16xf32>
    %37 = vector.extract_strided_slice %14 {offsets = [1, 0, 0], sizes = [8, 8, 16], strides = [1, 1, 1]} : vector<10x10x16xf32> to vector<8x8x16xf32>
    %38 = vector.shape_cast %37 : vector<8x8x16xf32> to vector<64x16xf32>
    %39 = arith.truncf %38 : vector<64x16xf32> to vector<64x16xbf16>
    %c3 = arith.constant 3 : index
    %c0_29 = arith.constant 0 : index
    %c0_30 = arith.constant 0 : index
    %40 = vector.load %arg4[%c3, %c0_29, %c0_30] : memref<9x16x16xbf16, #tpu.memory_space<vmem>>, vector<1x16x16xbf16>
    %41 = vector.shape_cast %40 : vector<1x16x16xbf16> to vector<16x16xbf16>
    %cst_31 = arith.constant dense<0.000000e+00> : vector<64x16xf32>
    %42 = tpu.matmul %39, %41, %cst_31 {dimension_numbers = #tpu.dot_dimension_numbers<[1], [0], [0], [1], [0, 0, 1, 1], [], []>} : vector<64x16xbf16>, vector<16x16xbf16>, vector<64x16xf32> -> vector<64x16xf32>
    %43 = arith.addf %36, %42 : vector<64x16xf32>
    %44 = vector.extract_strided_slice %14 {offsets = [1, 1, 0], sizes = [8, 8, 16], strides = [1, 1, 1]} : vector<10x10x16xf32> to vector<8x8x16xf32>
    %45 = vector.shape_cast %44 : vector<8x8x16xf32> to vector<64x16xf32>
    %46 = arith.truncf %45 : vector<64x16xf32> to vector<64x16xbf16>
    %c4 = arith.constant 4 : index
    %c0_32 = arith.constant 0 : index
    %c0_33 = arith.constant 0 : index
    %47 = vector.load %arg4[%c4, %c0_32, %c0_33] : memref<9x16x16xbf16, #tpu.memory_space<vmem>>, vector<1x16x16xbf16>
    %48 = vector.shape_cast %47 : vector<1x16x16xbf16> to vector<16x16xbf16>
    %cst_34 = arith.constant dense<0.000000e+00> : vector<64x16xf32>
    %49 = tpu.matmul %46, %48, %cst_34 {dimension_numbers = #tpu.dot_dimension_numbers<[1], [0], [0], [1], [0, 0, 1, 1], [], []>} : vector<64x16xbf16>, vector<16x16xbf16>, vector<64x16xf32> -> vector<64x16xf32>
    %50 = arith.addf %43, %49 : vector<64x16xf32>
    %51 = vector.extract_strided_slice %14 {offsets = [1, 2, 0], sizes = [8, 8, 16], strides = [1, 1, 1]} : vector<10x10x16xf32> to vector<8x8x16xf32>
    %52 = vector.shape_cast %51 : vector<8x8x16xf32> to vector<64x16xf32>
    %53 = arith.truncf %52 : vector<64x16xf32> to vector<64x16xbf16>
    %c5 = arith.constant 5 : index
    %c0_35 = arith.constant 0 : index
    %c0_36 = arith.constant 0 : index
    %54 = vector.load %arg4[%c5, %c0_35, %c0_36] : memref<9x16x16xbf16, #tpu.memory_space<vmem>>, vector<1x16x16xbf16>
    %55 = vector.shape_cast %54 : vector<1x16x16xbf16> to vector<16x16xbf16>
    %cst_37 = arith.constant dense<0.000000e+00> : vector<64x16xf32>
    %56 = tpu.matmul %53, %55, %cst_37 {dimension_numbers = #tpu.dot_dimension_numbers<[1], [0], [0], [1], [0, 0, 1, 1], [], []>} : vector<64x16xbf16>, vector<16x16xbf16>, vector<64x16xf32> -> vector<64x16xf32>
    %57 = arith.addf %50, %56 : vector<64x16xf32>
    %58 = vector.extract_strided_slice %14 {offsets = [2, 0, 0], sizes = [8, 8, 16], strides = [1, 1, 1]} : vector<10x10x16xf32> to vector<8x8x16xf32>
    %59 = vector.shape_cast %58 : vector<8x8x16xf32> to vector<64x16xf32>
    %60 = arith.truncf %59 : vector<64x16xf32> to vector<64x16xbf16>
    %c6 = arith.constant 6 : index
    %c0_38 = arith.constant 0 : index
    %c0_39 = arith.constant 0 : index
    %61 = vector.load %arg4[%c6, %c0_38, %c0_39] : memref<9x16x16xbf16, #tpu.memory_space<vmem>>, vector<1x16x16xbf16>
    %62 = vector.shape_cast %61 : vector<1x16x16xbf16> to vector<16x16xbf16>
    %cst_40 = arith.constant dense<0.000000e+00> : vector<64x16xf32>
    %63 = tpu.matmul %60, %62, %cst_40 {dimension_numbers = #tpu.dot_dimension_numbers<[1], [0], [0], [1], [0, 0, 1, 1], [], []>} : vector<64x16xbf16>, vector<16x16xbf16>, vector<64x16xf32> -> vector<64x16xf32>
    %64 = arith.addf %57, %63 : vector<64x16xf32>
    %65 = vector.extract_strided_slice %14 {offsets = [2, 1, 0], sizes = [8, 8, 16], strides = [1, 1, 1]} : vector<10x10x16xf32> to vector<8x8x16xf32>
    %66 = vector.shape_cast %65 : vector<8x8x16xf32> to vector<64x16xf32>
    %67 = arith.truncf %66 : vector<64x16xf32> to vector<64x16xbf16>
    %c7 = arith.constant 7 : index
    %c0_41 = arith.constant 0 : index
    %c0_42 = arith.constant 0 : index
    %68 = vector.load %arg4[%c7, %c0_41, %c0_42] : memref<9x16x16xbf16, #tpu.memory_space<vmem>>, vector<1x16x16xbf16>
    %69 = vector.shape_cast %68 : vector<1x16x16xbf16> to vector<16x16xbf16>
    %cst_43 = arith.constant dense<0.000000e+00> : vector<64x16xf32>
    %70 = tpu.matmul %67, %69, %cst_43 {dimension_numbers = #tpu.dot_dimension_numbers<[1], [0], [0], [1], [0, 0, 1, 1], [], []>} : vector<64x16xbf16>, vector<16x16xbf16>, vector<64x16xf32> -> vector<64x16xf32>
    %71 = arith.addf %64, %70 : vector<64x16xf32>
    %72 = vector.extract_strided_slice %14 {offsets = [2, 2, 0], sizes = [8, 8, 16], strides = [1, 1, 1]} : vector<10x10x16xf32> to vector<8x8x16xf32>
    %73 = vector.shape_cast %72 : vector<8x8x16xf32> to vector<64x16xf32>
    %74 = arith.truncf %73 : vector<64x16xf32> to vector<64x16xbf16>
    %c8 = arith.constant 8 : index
    %c0_44 = arith.constant 0 : index
    %c0_45 = arith.constant 0 : index
    %75 = vector.load %arg4[%c8, %c0_44, %c0_45] : memref<9x16x16xbf16, #tpu.memory_space<vmem>>, vector<1x16x16xbf16>
    %76 = vector.shape_cast %75 : vector<1x16x16xbf16> to vector<16x16xbf16>
    %cst_46 = arith.constant dense<0.000000e+00> : vector<64x16xf32>
    %77 = tpu.matmul %74, %76, %cst_46 {dimension_numbers = #tpu.dot_dimension_numbers<[1], [0], [0], [1], [0, 0, 1, 1], [], []>} : vector<64x16xbf16>, vector<16x16xbf16>, vector<64x16xf32> -> vector<64x16xf32>
    %78 = arith.addf %71, %77 : vector<64x16xf32>
    %c0_47 = arith.constant 0 : index
    %c0_48 = arith.constant 0 : index
    %79 = vector.load %arg5[%c0_47, %c0_48] : memref<1x16xf32, #tpu.memory_space<vmem>>, vector<1x16xf32>
    %80 = vector.broadcast %79 : vector<1x16xf32> to vector<64x16xf32>
    %81 = arith.addf %78, %80 : vector<64x16xf32>
    %cst_49 = arith.constant 0.000000e+00 : f32
    %82 = vector.broadcast %cst_49 : f32 to vector<64x16xf32>
    %83 = arith.maximumf %81, %82 : vector<64x16xf32>
    %84 = arith.truncf %83 : vector<64x16xf32> to vector<64x16xbf16>
    %c0_50 = arith.constant 0 : index
    %c0_51 = arith.constant 0 : index
    %85 = vector.load %arg6[%c0_50, %c0_51] : memref<16x32xbf16, #tpu.memory_space<vmem>>, vector<16x32xbf16>
    %cst_52 = arith.constant dense<0.000000e+00> : vector<64x32xf32>
    %86 = tpu.matmul %84, %85, %cst_52 {dimension_numbers = #tpu.dot_dimension_numbers<[1], [0], [0], [1], [0, 0, 1, 1], [], []>} : vector<64x16xbf16>, vector<16x32xbf16>, vector<64x32xf32> -> vector<64x32xf32>
    %c0_53 = arith.constant 0 : index
    %c0_54 = arith.constant 0 : index
    %87 = vector.load %arg7[%c0_53, %c0_54] : memref<1x32xf32, #tpu.memory_space<vmem>>, vector<1x32xf32>
    %88 = vector.broadcast %87 : vector<1x32xf32> to vector<64x32xf32>
    %89 = arith.addf %86, %88 : vector<64x32xf32>
    %90 = vector.shape_cast %1 : vector<8x8x8xbf16> to vector<64x8xbf16>
    %c0_55 = arith.constant 0 : index
    %c0_56 = arith.constant 0 : index
    %91 = vector.load %arg8[%c0_55, %c0_56] : memref<8x32xbf16, #tpu.memory_space<vmem>>, vector<8x32xbf16>
    %cst_57 = arith.constant dense<0.000000e+00> : vector<64x32xf32>
    %92 = tpu.matmul %90, %91, %cst_57 {dimension_numbers = #tpu.dot_dimension_numbers<[1], [0], [0], [1], [0, 0, 1, 1], [], []>} : vector<64x8xbf16>, vector<8x32xbf16>, vector<64x32xf32> -> vector<64x32xf32>
    %c0_58 = arith.constant 0 : index
    %c0_59 = arith.constant 0 : index
    %93 = vector.load %arg9[%c0_58, %c0_59] : memref<1x32xf32, #tpu.memory_space<vmem>>, vector<1x32xf32>
    %94 = vector.broadcast %93 : vector<1x32xf32> to vector<64x32xf32>
    %95 = arith.addf %92, %94 : vector<64x32xf32>
    %96 = arith.addf %89, %95 : vector<64x32xf32>
    %cst_60 = arith.constant 0.000000e+00 : f32
    %97 = vector.broadcast %cst_60 : f32 to vector<64x32xf32>
    %98 = arith.maximumf %96, %97 : vector<64x32xf32>
    %99 = vector.shape_cast %98 : vector<64x32xf32> to vector<8x8x32xf32>
    %c0_61 = arith.constant 0 : index
    %c0_62 = arith.constant 0 : index
    %c0_63 = arith.constant 0 : index
    %c0_64 = arith.constant 0 : index
    %100 = vector.load %arg10[%c0_61, %c0_62, %c0_63, %c0_64] : memref<1x8x8x32xf32, #tpu.memory_space<vmem>>, vector<1x8x8x32xf32>
    %101 = vector.shape_cast %100 : vector<1x8x8x32xf32> to vector<8x8x32xf32>
    %102 = vector.shape_cast %99 : vector<8x8x32xf32> to vector<1x8x8x32xf32>
    tpu.vector_store %arg10[%c0_61, %c0_62, %c0_63, %c0_64], %102 {strides = array<i32>} : memref<1x8x8x32xf32, #tpu.memory_space<vmem>>, vector<1x8x8x32xf32>,
    return
  }
  func.func @transform_0(%arg0: i32) -> (i32, i32, i32, i32) {
    %c0_i32 = arith.constant 0 : i32
    %c0_i32_0 = arith.constant 0 : i32
    %c0_i32_1 = arith.constant 0 : i32
    %c0_i32_2 = arith.constant 0 : i32
    return %arg0, %c0_i32, %c0_i32_0, %c0_i32_1 : i32, i32, i32, i32
  }
  func.func @transform_1(%arg0: i32) -> (i32, i32) {
    %c0_i32 = arith.constant 0 : i32
    %c0_i32_0 = arith.constant 0 : i32
    %c0_i32_1 = arith.constant 0 : i32
    return %c0_i32, %c0_i32_0 : i32, i32
  }
  func.func @transform_2(%arg0: i32) -> (i32, i32) {
    %c0_i32 = arith.constant 0 : i32
    %c0_i32_0 = arith.constant 0 : i32
    %c0_i32_1 = arith.constant 0 : i32
    return %c0_i32, %c0_i32_0 : i32, i32
  }
  func.func @transform_3(%arg0: i32) -> (i32, i32, i32) {
    %c0_i32 = arith.constant 0 : i32
    %c0_i32_0 = arith.constant 0 : i32
    %c0_i32_1 = arith.constant 0 : i32
    %c0_i32_2 = arith.constant 0 : i32
    return %c0_i32, %c0_i32_0, %c0_i32_1 : i32, i32, i32
  }
  func.func @transform_4(%arg0: i32) -> (i32, i32) {
    %c0_i32 = arith.constant 0 : i32
    %c0_i32_0 = arith.constant 0 : i32
    %c0_i32_1 = arith.constant 0 : i32
    return %c0_i32, %c0_i32_0 : i32, i32
  }
  func.func @transform_5(%arg0: i32) -> (i32, i32) {
    %c0_i32 = arith.constant 0 : i32
    %c0_i32_0 = arith.constant 0 : i32
    %c0_i32_1 = arith.constant 0 : i32
    return %c0_i32, %c0_i32_0 : i32, i32
  }
  func.func @transform_6(%arg0: i32) -> (i32, i32) {
    %c0_i32 = arith.constant 0 : i32
    %c0_i32_0 = arith.constant 0 : i32
    %c0_i32_1 = arith.constant 0 : i32
    return %c0_i32, %c0_i32_0 : i32, i32
  }
  func.func @transform_7(%arg0: i32) -> (i32, i32) {
    %c0_i32 = arith.constant 0 : i32
    %c0_i32_0 = arith.constant 0 : i32
    %c0_i32_1 = arith.constant 0 : i32
    return %c0_i32, %c0_i32_0 : i32, i32
  }
  func.func @transform_8(%arg0: i32) -> (i32, i32) {
    %c0_i32 = arith.constant 0 : i32
    %c0_i32_0 = arith.constant 0 : i32
    %c0_i32_1 = arith.constant 0 : i32
    return %c0_i32, %c0_i32_0 : i32, i32
  }
  func.func @transform_9(%arg0: i32) -> (i32, i32, i32, i32) {
    %c0_i32 = arith.constant 0 : i32
    %c0_i32_0 = arith.constant 0 : i32
    %c0_i32_1 = arith.constant 0 : i32
    %c0_i32_2 = arith.constant 0 : i32
    return %arg0, %c0_i32, %c0_i32_0, %c0_i32_1 : i32, i32, i32, i32
  }
}

</mosaic_0001>

<bundles_post_ra>
// kernel: block_forward_pallas.1
= control target key start
LH: loop header
LB: loop body
LE: loop exit
PB: predicated region body
PF: predicated region fallthrough
CT: control target
= control target key end

     0   :  { %14 = vsyncpa [#allocation4], 0  ;;  %s2668_s0 = inlined_call_operand.vmem [shape: bf16[2,8,8,8], index: 0, kind: input, shape index: {}]   ;;  %s2669_s1 = inlined_call_operand.vmem [shape: bf16[8,16], index: 1, kind: input, shape index: {}]   ;;  %s2670_s2 = inlined_call_operand.vmem [shape: f32[1,16], index: 2, kind: input, shape index: {}]   ;;  %s2671_s3 = inlined_call_operand.vmem [shape: bf16[9,16,16], index: 3, kind: input, shape index: {}]   ;;  %s2672_s4 = inlined_call_operand.vmem [shape: f32[1,16], index: 4, kind: input, shape index: {}]   ;;  %s2673_s5 = inlined_call_operand.vmem [shape: bf16[16,32], index: 5, kind: input, shape index: {}]   ;;  %s2674_s6 = inlined_call_operand.vmem [shape: f32[1,32], index: 6, kind: input, shape index: {}]   ;;  %s2675_s7 = inlined_call_operand.vmem [shape: bf16[8,32], index: 7, kind: input, shape index: {}]   ;;  %s2676_s8 = inlined_call_operand.vmem [shape: f32[1,32], index: 8, kind: input, shape index: {}]   ;;  %s2677_s9 = inlined_call_operand.hbm [shape: f32[2,8,8,32], index: 9, kind: output, shape index: {}]  }
   0x1   :  { %16 = vsyncpa [#allocation4 + $0x1], 0  ;;  %s2276_s30 = smov 0   ;;  %s2278_s10 = smov 0  }
   0x2   :  { %s2280_s11 = smov 0   ;;  %s2282_s12 = smov 0  }
   0x3 LB: > { %s2297_s13 = sadd.s32 4294967295, %s2220_s12   ;;  %s1736_s14 = sadd.s32 4294967294, %s2220_s12   ;;  %s2220_s12 = sphi %s2282_s12, %s2683_s12   ;;  %s2216_s11 = sphi %s2280_s11, %s2682_s11   ;;  %s2212_s10 = sphi %s2278_s10, %s2681_s10   ;;  %s2208_s30 = sphi %s2276_s30, %s2680_s30  }
   0x4   : > { %s2301_s15 = sadd.s32 1, %s2220_s12   ;;  %s223_s16 = sadd.s32 1, %s2216_s11 }
   0x5   : > { %s220_s17 = ssub.s32 %s2220_s12, %s2301_s15  ;;  %p233_p0 = scmp.ne.s32.totalorder %s2216_s11, %s2212_s10 }
   0x6   : > { %p221_p1 = scmp.eq.s32.totalorder %s220_s17, 0  ;;  %p234_p2 = scmp.eq.s32.totalorder %s2297_s13, 1 }
   0x7   : > { %p239_p3 = scmp.ne.s32.totalorder %s2212_s10, %s2208_s30  ;;  %p240_p4 = scmp.eq.s32.totalorder %s1736_s14, 1 }
   0x8   : > { %s2312_s18 = scalar_select %p221_p1, %s2216_s11, %s223_s16  }
   0x9   : > { %p2314_p5 = por %p234_p2, %p233_p0  ;;  %p2318_p6 = por %p240_p4, %p239_p3 }
   0xa   : > { %p1739_p7 = scmp.ge.s32.totalorder %s2220_s12, 1  ;;  %p290_p8 = scmp.lt.s32.totalorder %s2220_s12, 3 }
   0xc   : > { %p291_p9 = pnand %p1739_p7, %p290_p8 }
   0xd   : > { %v340_v0 = vld [vmem:[%s2669_s1] sm:$0xf] (!%p291_p9)  ;;  %vm381_vm0 = vcmask (!%p291_p9), 1043456   ;;  %p326_p10 = scmp.lt.s32.totalorder (!%p291_p9), %s2297_s13, 1  ;;  %vm368_vm1 = vcmask (!%p291_p9), 64512   ;;  %vm458_vm2 = vcmask (!%p291_p9), 130048  }
   0xe   : > { %294 = sbr.rel (%p291_p9) target bundleno = 819 (0x333), region = 56  ;;  %2100 = vmatprep.subr.msk.bf16.mxu0 (!%p291_p9), %vm381_vm0, %v340_v0  ;;  %v383_v1 = vsel (!%p291_p9), %vm381_vm0, %v340_v0, 0  ;;  %vm460_vm3 = vcmask (!%p291_p9), 123904   ;;  %v2222_v6 = vmov (!%p291_p9), 0.0   ;;  %v2148_v7 = vld [vmem:[%s2671_s3 + $0x18] sm:$0xff] (!%p291_p9)   ;;  %v2149_v8 = vld [vmem:[%s2671_s3 + $0x8] sm:$0xff] (!%p291_p9)  }
   0xf   : > { %1893 = vmatpush3.bf16.msra.mxu0 (!%p291_p9), %v383_v1  ;;  %466 = vst.msk [vmem:[#allocation2 + $0x30] sm:$0xff] (!%p291_p9), %vm458_vm2, %v2222_v6  ;;  %459 = vst.msk [vmem:[#allocation2] sm:$0xff] (!%p291_p9), %vm458_vm2, %v2222_v6  ;;  %1932 = vmatprep.subr.bf16.mxu1 (!%p291_p9), %v2148_v7  ;;  %v2379_v9 = vld [vmem:[%s2671_s3 + $0x20] sm:$0xff] (!%p291_p9)   ;;  %vm531_vm4 = vcmask (!%p291_p9), 1046528   ;;  %v2152_v61 = vld [vmem:[%s2671_s3 + $0x28] sm:$0xff] (!%p291_p9)   ;;  %vm737_vm5 = vcmask (!%p291_p9), 1045504  }
  0x10   : > { %467 = vst.msk [vmem:[#allocation2 + $0x38] sm:$0x3] (!%p291_p9), %vm460_vm3, %v2222_v6  ;;  %461 = vst.msk [vmem:[#allocation2 + $0x8] sm:$0x3] (!%p291_p9), %vm460_vm3, %v2222_v6  ;;  %1933 = vmatpush3.bf16.msra.mxu1 (!%p291_p9), %v2148_v7  ;;  %1902 = vmatprep.subr.bf16.mxu0 (!%p291_p9), %v2149_v8  ;;  %v2385_v10 = vld [vmem:[%s2671_s3] sm:$0xff] (!%p291_p9)   ;;  %v2153_v1 = vld [vmem:[%s2671_s3 + $0x10] sm:$0xff] (!%p291_p9)  }
  0x11   : > { %462 = vst.msk [vmem:[#allocation2 + $0x10] sm:$0xff] (!%p291_p9), %vm458_vm2, %v2222_v6  ;;  %464 = vst.msk [vmem:[#allocation2 + $0x20] sm:$0xff] (!%p291_p9), %vm458_vm2, %v2222_v6  ;;  %1942 = vmatprep.subr.bf16.mxu1 (!%p291_p9), %v2379_v9  ;;  %v1743_v11 = vld [vmem:[%s2670_s2] ss:$0 sm:$0xff] (!%p291_p9)  ;;  %s323_s22 = sand.u32 (!%p291_p9), 1, %s2212_s10   ;;  %vm1651_vm6 = vcmask (!%p291_p9), 261120  }
  0x12   : > { %463 = vst.msk [vmem:[#allocation2 + $0x18] sm:$0x3] (!%p291_p9), %vm460_vm3, %v2222_v6  ;;  %465 = vst.msk [vmem:[#allocation2 + $0x28] sm:$0x3] (!%p291_p9), %vm460_vm3, %v2222_v6  ;;  %s1831_s25 = sshll.u32 (!%p291_p9), %s2297_s13, 10  ;;  %s2223_s16 = smov (!%p291_p9), [#allocation3]  }
  0x13   : > { %468 = vst.msk [vmem:[#allocation2 + $0x40] sm:$0xff] (!%p291_p9), %vm458_vm2, %v2222_v6  ;;  %470 = vst.msk [vmem:[#allocation2 + $0x50] sm:$0xff] (!%p291_p9), %vm458_vm2, %v2222_v6  ;;  %s2618_s29 = scalar_lea.hbm (!%p291_p9), %s2677_s9, %s1831_s25  ;;  %s2162_s17 = sshll.u32 (!%p291_p9), %s2223_s16, 4  ;;  %s2163_s17 = int_to_ptr.vmem [resolvable:$false] %s2162_s17 }
  0x14   : > { %469 = vst.msk [vmem:[#allocation2 + $0x48] sm:$0x3] (!%p291_p9), %vm460_vm3, %v2222_v6  ;;  %471 = vst.msk [vmem:[#allocation2 + $0x58] sm:$0x3] (!%p291_p9), %vm460_vm3, %v2222_v6  ;;  %s2164_s21 = scalar_lea.vmem (!%p291_p9), %s2163_s17, 2048 }
  0x15   : > { %s327_s23 = scalar_select %p326_p10, %s2297_s13, 1  ;;  %472 = vst.msk [vmem:[#allocation2 + $0x60] sm:$0xff] %vm458_vm2, %v2222_v6  ;;  %474 = vst.msk [vmem:[#allocation2 + $0x70] sm:$0xff] %vm458_vm2, %v2222_v6 }
  0x16   : > { %473 = vst.msk [vmem:[#allocation2 + $0x68] sm:$0x3] %vm460_vm3, %v2222_v6  ;;  %475 = vst.msk [vmem:[#allocation2 + $0x78] sm:$0x3] %vm460_vm3, %v2222_v6  ;;  %v2395_v25 = vld [vmem:[#allocation2] sm:$0xff]  ;;  %s2627_s13 = scalar_lea.sflag [#allocation4], %s323_s22 }
  0x17   : > { %s1830_s24 = sshll.u32 %s327_s23, 5  ;;  %476 = vst.msk [vmem:[#allocation2 + $0x80] sm:$0xff] %vm458_vm2, %v2222_v6  ;;  %478 = vst.msk [vmem:[#allocation2 + $0x90] sm:$0xff] %vm458_vm2, %v2222_v6  ;;  %v2397_v26 = vld [vmem:[#allocation2 + $0x8] sm:$0x3]  ;;  %v532_v34 = vrot.slane %v2395_v25, 1 }
  0x18   : > { %s330_s27 = scalar_lea.vmem %s2668_s0, %s1830_s24  ;;  %477 = vst.msk [vmem:[#allocation2 + $0x88] sm:$0x3] %vm460_vm3, %v2222_v6  ;;  %479 = vst.msk [vmem:[#allocation2 + $0x98] sm:$0x3] %vm460_vm3, %v2222_v6  ;;  %v533_v35 = vrot.slane %v2397_v26, 1  ;;  %s1740_s23 = sshll.u32 %s323_s22, 6 }
  0x19   : > { %v2334_v2 = vld [vmem:[%s330_s27] sm:$0xff]   ;;  %v2336_v3 = vld [vmem:[%s330_s27 + $0x8] sm:$0xff]   ;;  %v2340_v4 = vld [vmem:[%s330_s27 + $0x10] sm:$0xff]   ;;  %s325_s24 = scalar_lea.vmem [#allocation3], %s1740_s23 }
  0x1a   : > { %1894 = vmatprep.mubr.msk.bf16.mxu0 %vm368_vm1, %v2334_v2  ;;  %v2346_v5 = vld [vmem:[%s330_s27 + $0x18] sm:$0xff]   ;;  %v534_v50 = vsel %vm531_vm4, %v532_v34, %v533_v35  ;;  %s1674_s26 = sshll.u32 %s325_s24, 4  ;;  %s2620_s26 = int_to_ptr.vmem [resolvable:$true] %s1674_s26 }
  0x1b   : > { %1895 = vmatmul.mubr.msk.bf16.vlgmr.msra.gmra.mrb[0].mxu0 %vm368_vm1, %v2336_v3  ;;  %s2158_s14 = scalar_lea.vmem %s2620_s26, 1024  ;;  %p2165_p0 = scmp.lt.s32.totalorder %s2620_s26, %s2163_s17 }
  0x1c   : > { %1898 = vmatprep.mubr.msk.bf16.mxu0 %vm368_vm1, %v2340_v4  ;;  %1903 = vmatpush3.bf16.msra.mxu0 %v2149_v8  ;;  %p2159_p11 = scmp.ne.s32.totalorder %s2620_s26, %s2158_s14  ;;  %p2166_p1 = scmp.lt.s32.totalorder %s2164_s21, %s2158_s14 }
  0x1d   : > { %1912 = vmatprep.subr.bf16.mxu0 %v2385_v10 }
  0x1e   : > { %p2160_p12 = pnand %p2159_p11, %p2314_p5  ;;  %p2167_p2 = por %p2166_p1, %p2165_p0 }
  0x20   : > { %p2161_p13 = pneg %p2160_p12 }
  0x22   : > { %p2168_p3 = pnand %p2167_p2, %p2161_p13 }
  0x23   : > { %1899 = vmatmul.mubr.msk.bf16.gmra.mrb[4].mxu0 %vm368_vm1, %v2346_v5 }
  0xee   : > { %v1896_v12 = vpop.f32.mrb[0].mxu0 }
  0xef   : > { %v428_v13 = vadd.f32 %v1896_v12, %v1743_v11  ;;  %v419_v14 = vpop.f32.mrb[1].mxu0 }
  0xf0   : > { %v420_v15 = vadd.f32 %v1743_v11, %v419_v14  ;;  %v1897_v16 = vpop.f32.mrb[2].mxu0 }
  0xf1   : > { %v452_v17 = vmax.f32 %v428_v13, 0.0  ;;  %v431_v18 = vadd.f32 %v1897_v16, %v1743_v11  ;;  %v422_v19 = vpop.f32.mrb[3].mxu0 }
  0xf2   : > { %v450_v20 = vmax.f32 %v420_v15, 0.0  ;;  %v423_v21 = vadd.f32 %v1743_v11, %v422_v19 }
  0xf3   : > { %483 = vst.msk [vmem:[#allocation2 + $0x31] sm:$0xff] %vm458_vm2, %v452_v17  ;;  %v453_v22 = vmax.f32 %v431_v18, 0.0 }
  0xf4   : > { %481 = vst.msk [vmem:[#allocation2 + $0x11] sm:$0xff] %vm458_vm2, %v450_v20  ;;  %v451_v23 = vmax.f32 %v423_v21, 0.0 }
  0xf5   : > { %484 = vst.msk [vmem:[#allocation2 + $0x41] sm:$0xff] %vm458_vm2, %v453_v22 }
  0xf6   : > { %482 = vst.msk [vmem:[#allocation2 + $0x21] sm:$0xff] %vm458_vm2, %v451_v23  ;;  %v1900_v24 = vpop.f32.mrb[4].mxu0 }
  0xf7   : > { %v444_v27 = vadd.f32 %v1900_v24, %v1743_v11  ;;  %v435_v28 = vpop.f32.mrb[5].mxu0 }
  0xf8   : > { %v436_v29 = vadd.f32 %v1743_v11, %v435_v28  ;;  %v1901_v30 = vpop.f32.mrb[6].mxu0 }
  0xf9   : > { %v456_v31 = vmax.f32 %v444_v27, 0.0  ;;  %v447_v32 = vadd.f32 %v1901_v30, %v1743_v11  ;;  %v438_v33 = vpop.f32.mrb[7].mxu0 }
  0xfa   : > { %v454_v36 = vmax.f32 %v436_v29, 0.0  ;;  %v439_v37 = vadd.f32 %v1743_v11, %v438_v33  ;;  %v2401_v38 = vld [vmem:[#allocation2 + $0x30] sm:$0xff]  ;;  %v2403_v39 = vld [vmem:[#allocation2 + $0x38] sm:$0x3] }
  0xfb   : > { %487 = vst.msk [vmem:[#allocation2 + $0x71] sm:$0xff] %vm458_vm2, %v456_v31  ;;  %v457_v40 = vmax.f32 %v447_v32, 0.0  ;;  %v2406_v41 = vld [vmem:[#allocation2 + $0x10] sm:$0xff]  ;;  %v541_v42 = vrot.slane %v2401_v38, 1  ;;  %v2409_v43 = vld [vmem:[#allocation2 + $0x18] sm:$0x3] }
  0xfc   : > { %485 = vst.msk [vmem:[#allocation2 + $0x51] sm:$0xff] %vm458_vm2, %v454_v36  ;;  %v455_v44 = vmax.f32 %v439_v37, 0.0  ;;  %v535_v45 = vrot.slane %v2406_v41, 1  ;;  %v542_v46 = vrot.slane %v2403_v39, 1  ;;  %v536_v47 = vrot.slane %v2409_v43, 1  ;;  %v2421_v51 = vld [vmem:[#allocation2 + $0x40] sm:$0xff] }
  0xfd   : > { %488 = vst.msk [vmem:[#allocation2 + $0x81] sm:$0xff] %vm458_vm2, %v457_v40  ;;  %v2416_v48 = vld [vmem:[#allocation2 + $0x20] sm:$0xff]  ;;  %v2418_v49 = vld [vmem:[#allocation2 + $0x28] sm:$0x3]  ;;  %v869_v60 = vpack.c.bf16 %v2421_v51, %v2401_v38  ;;  %v544_v63 = vrot.slane %v2421_v51, 1  ;;  %v509_v30 = vpack.c.bf16 %v2406_v41, %v2395_v25  ;;  %v2154_v33 = vld [vmem:[%s2671_s3 + $0x30] sm:$0xff]  }
  0xfe   : > { %486 = vst.msk [vmem:[#allocation2 + $0x61] sm:$0xff] %vm458_vm2, %v455_v44  ;;  %v538_v52 = vrot.slane %v2416_v48, 1  ;;  %v539_v53 = vrot.slane %v2418_v49, 1  ;;  %v2426_v54 = vld [vmem:[#allocation2 + $0x48] sm:$0x3]  ;;  %v868_v55 = vpack.c.bf16 %v2416_v48, %v2406_v41  ;;  %v537_v56 = vsel %vm531_vm4, %v535_v45, %v536_v47 }
  0xff   : > { %v543_v58 = vsel %vm531_vm4, %v541_v42, %v542_v46  ;;  %v564_v59 = vpack.c.bf16 %v537_v56, %v534_v50  ;;  %v545_v0 = vrot.slane %v2426_v54, 1  ;;  %v510_v37 = vpack.c.bf16 %v2401_v38, %v2416_v48 }
 0x100   : > { %v540_v57 = vsel %vm531_vm4, %v538_v52, %v539_v53  ;;  %1934 = vmatprep.mubr.msk.bf16.mxu1 %vm458_vm2, %v868_v55  ;;  %v744_v40 = vrot.slane %v2416_v48, 2  ;;  %v745_v42 = vrot.slane %v2418_v49, 2  ;;  %v741_v45 = vrot.slane %v2406_v41, 2 }
 0x101   : > { %v2438_v62 = vpack.c.bf16 %v543_v58, %v540_v57  ;;  %1904 = vmatprep.mubr.msk.bf16.mxu0 %vm458_vm2, %v564_v59  ;;  %1935 = vmatmul.mubr.msk.bf16.vlgmr.msra.gmra.mrb[0].mxu1 %vm458_vm2, %v869_v60  ;;  %v972_v28 = vpack.c.bf16 %v540_v57, %v537_v56  ;;  %v742_v46 = vrot.slane %v2409_v43, 2  ;;  %v738_v47 = vrot.slane %v2395_v25, 2 }
 0x102   : > { %v2448_v6 = vld [vmem:[#allocation2 + $0x70] sm:$0xff]  ;;  %v2450_v7 = vld [vmem:[#allocation2 + $0x78] sm:$0x3]  ;;  %1943 = vmatpush3.bf16.msra.mxu1 %v2379_v9  ;;  %v546_v9 = vsel %vm531_vm4, %v544_v63, %v545_v0  ;;  %v739_v48 = vrot.slane %v2397_v26, 2  ;;  %v746_v50 = vsel %vm737_vm5, %v744_v40, %v745_v42  ;;  %v750_v25 = vrot.slane %v2421_v51, 2 }
 0x103   : > { %1905 = vmatmul.mubr.msk.bf16.vlgmr.msra.gmra.mrb[8].mxu0 %vm458_vm2, %v2438_v62  ;;  %v2455_v8 = vld [vmem:[#allocation2 + $0x50] sm:$0xff]  ;;  %v2457_v11 = vld [vmem:[#allocation2 + $0x58] sm:$0x3]  ;;  %v553_v14 = vrot.slane %v2448_v6, 1  ;;  %v554_v15 = vrot.slane %v2450_v7, 1  ;;  %1952 = vmatprep.subr.bf16.mxu1 %v2152_v61  ;;  %v973_v32 = vpack.c.bf16 %v546_v9, %v543_v58  ;;  %v743_v52 = vsel %vm737_vm5, %v741_v45, %v742_v46 }
 0x104   : > { %v547_v12 = vrot.slane %v2455_v8, 1  ;;  %v548_v13 = vrot.slane %v2457_v11, 1  ;;  %1913 = vmatpush3.bf16.msra.mxu0 %v2385_v10  ;;  %v2467_v17 = vld [vmem:[#allocation2 + $0x80] sm:$0xff]  ;;  %v2494_v31 = vld [vmem:[#allocation2 + $0x88] sm:$0x3]  ;;  %v511_v44 = vpack.c.bf16 %v2455_v8, %v2421_v51  ;;  %v740_v43 = vsel %vm737_vm5, %v738_v47, %v739_v48 }
 0x105   : > { %v2464_v16 = vld [vmem:[#allocation2 + $0x60] sm:$0xff]  ;;  %v2469_v18 = vld [vmem:[#allocation2 + $0x68] sm:$0x3]  ;;  %1922 = vmatprep.subr.bf16.mxu0 %v2153_v1  ;;  %v871_v23 = vpack.c.bf16 %v2467_v17, %v2448_v6  ;;  %v555_v27 = vsel %vm531_vm4, %v553_v14, %v554_v15  ;;  %v968_v35 = vrot.slane %v2467_v17, 1  ;;  %v969_v36 = vrot.slane %v2494_v31, 1 }
 0x106   : > { %v870_v19 = vpack.c.bf16 %v2464_v16, %v2455_v8  ;;  %v549_v20 = vsel %vm531_vm4, %v547_v12, %v548_v13  ;;  %v550_v21 = vrot.slane %v2464_v16, 1  ;;  %v551_v22 = vrot.slane %v2469_v18, 1  ;;  %v1813_v45 = vld [vmem:[%s2672_s4] ss:$0 sm:$0xff] }
 0x107   : > { %v2476_v10 = vpack.c.bf16 %v549_v20, %v546_v9  ;;  %v2516_v49 = vsel %vm531_vm4, %v968_v35, %v969_v36  ;;  %v751_v26 = vrot.slane %v2426_v54, 2  ;;  %v1074_v53 = vpack.c.bf16 %v746_v50, %v743_v52 }
 0x108   : > { %1938 = vmatprep.mubr.msk.bf16.mxu1 %vm458_vm2, %v870_v19  ;;  %v552_v24 = vsel %vm531_vm4, %v550_v21, %v551_v22  ;;  %v975_v41 = vpack.c.bf16 %v2516_v49, %v555_v27  ;;  %v512_v55 = vpack.c.bf16 %v2448_v6, %v2464_v16  ;;  %v756_v56 = vrot.slane %v2464_v16, 2  ;;  %v508_v22 = vld [vmem:[#allocation2 + $0x98] sm:$0x3] }
 0x109   : > { %1908 = vmatprep.mubr.msk.bf16.mxu0 %vm458_vm2, %v2476_v10  ;;  %v2485_v29 = vpack.c.bf16 %v555_v27, %v552_v24  ;;  %1939 = vmatmul.mubr.msk.bf16.gmra.mrb[4].mxu1 %vm458_vm2, %v871_v23  ;;  %v974_v34 = vpack.c.bf16 %v552_v24, %v549_v20  ;;  %v757_v57 = vrot.slane %v2469_v18, 2  ;;  %v747_v58 = vrot.slane %v2401_v38, 2 }
 0x10a   : > { %1944 = vmatprep.mubr.msk.bf16.mxu1 %vm458_vm2, %v972_v28  ;;  %v748_v59 = vrot.slane %v2403_v39, 2  ;;  %v770_v60 = vpack.c.bf16 %v743_v52, %v740_v43  ;;  %v753_v51 = vrot.slane %v2455_v8, 2  ;;  %v754_v54 = vrot.slane %v2457_v11, 2 }
 0x10b   : > { %1909 = vmatmul.mubr.msk.bf16.gmra.mrb[12].mxu0 %vm458_vm2, %v2485_v29  ;;  %v758_v63 = vsel %vm737_vm5, %v756_v56, %v757_v57  ;;  %v1070_v8 = vrot.slane %v2467_v17, 2  ;;  %v1071_v11 = vrot.slane %v2494_v31, 2  ;;  %v759_v15 = vrot.slane %v2448_v6, 2  ;;  %v2156_v6 = vld [vmem:[%s2671_s3 + $0x40] sm:$0xff]  }
 0x10c   : > { %1914 = vmatprep.mubr.msk.bf16.mxu0 %vm458_vm2, %v509_v30  ;;  %v749_v0 = vsel %vm737_vm5, %v747_v58, %v748_v59  ;;  %v755_v39 = vsel %vm737_vm5, %v753_v51, %v754_v54  ;;  %v760_v16 = vrot.slane %v2450_v7, 2  ;;  %v507_v7 = vld [vmem:[#allocation2 + $0x90] sm:$0xff]  ;;  %v1261_v24 = vrot.slane %v508_v22, 1  ;;  %v1559_v31 = vld [vmem:[%s2675_s7] sm:$0xf] }
 0x10d   : > { %v1076_v12 = vpack.c.bf16 %v758_v63, %v755_v39  ;;  %v771_v13 = vpack.c.bf16 %v749_v0, %v746_v50  ;;  %v1072_v9 = vsel %vm737_vm5, %v1070_v8, %v1071_v11  ;;  %v1172_v21 = vpack.c.bf16 %v507_v7, %v2467_v17 }
 0x10e   : > { %v761_v18 = vsel %vm737_vm5, %v759_v15, %v760_v16  ;;  %v1260_v23 = vrot.slane %v507_v7, 1  ;;  %v1350_v17 = vrot.slane %v507_v7, 2  ;;  %v1820_v7 = vld [vmem:[%s2676_s8] ss:$0 sm:$0xff] }
 0x10f   : > { %v1077_v19 = vpack.c.bf16 %v1072_v9, %v761_v18  ;;  %v773_v20 = vpack.c.bf16 %v761_v18, %v758_v63 }
 0x110   : > { %v1262_v27 = vsel %vm531_vm4, %v1260_v23, %v1261_v24 }
 0x111   : > { %1945 = vmatmul.mubr.msk.bf16.vlgmr.msra.gmra.mrb[0].mxu1 %vm458_vm2, %v973_v32  ;;  %v1264_v28 = vpack.c.bf16 %v1262_v27, %v2516_v49 }
 0x112   : > { %1953 = vmatpush3.bf16.msra.mxu1 %v2152_v61  ;;  %1948 = vmatprep.mubr.msk.bf16.mxu1 %vm458_vm2, %v974_v34  ;;  %v752_v61 = vsel %vm737_vm5, %v750_v25, %v751_v26 }
 0x113   : > { %1915 = vmatmul.mubr.msk.bf16.vlgmr.msra.gmra.mrb[8].mxu0 %vm458_vm2, %v510_v37  ;;  %1962 = vmatprep.subr.bf16.mxu1 %v2154_v33  ;;  %v1075_v38 = vpack.c.bf16 %v752_v61, %v749_v0  ;;  %v772_v14 = vpack.c.bf16 %v755_v39, %v752_v61 }
 0x114   : > { %1918 = vmatprep.mubr.msk.bf16.mxu0 %vm458_vm2, %v511_v44  ;;  %1923 = vmatpush3.bf16.msra.mxu0 %v2153_v1  ;;  %v2155_v1 = vld [vmem:[%s2671_s3 + $0x38] sm:$0xff]  }
 0x119   : > { %1949 = vmatmul.mubr.msk.bf16.gmra.mrb[4].mxu1 %vm458_vm2, %v975_v41 }
 0x11a   : > { %1954 = vmatprep.mubr.msk.bf16.mxu1 %vm458_vm2, %v1074_v53 }
 0x11b   : > { %1919 = vmatmul.mubr.msk.bf16.gmra.mrb[12].mxu0 %vm458_vm2, %v512_v55 }
 0x11c   : > { %1924 = vmatprep.mubr.msk.bf16.mxu0 %vm458_vm2, %v770_v60 }
 0x121   : > { %1955 = vmatmul.mubr.msk.bf16.vlgmr.msra.gmra.mrb[0].mxu1 %vm458_vm2, %v1075_v38 }
 0x122   : > { %1963 = vmatpush3.bf16.msra.mxu1 %v2154_v33  ;;  %1958 = vmatprep.mubr.msk.bf16.mxu1 %vm458_vm2, %v1076_v12  ;;  %v1568_v12 = vsel %vm381_vm0, %v1559_v31, 0 }
 0x123   : > { %1925 = vmatmul.mubr.msk.bf16.vlgmr.msra.gmra.mrb[8].mxu0 %vm458_vm2, %v771_v13  ;;  %1972 = vmatprep.subr.bf16.mxu1 %v2155_v1 }
 0x124   : > { %1928 = vmatprep.mubr.msk.bf16.mxu0 %vm458_vm2, %v772_v14 }
 0x129   : > { %1959 = vmatmul.mubr.msk.bf16.gmra.mrb[4].mxu1 %vm458_vm2, %v1077_v19 }
 0x12a   : > { %1964 = vmatprep.mubr.msk.bf16.mxu1 %vm458_vm2, %v510_v37 }
 0x12b   : > { %1929 = vmatmul.mubr.msk.bf16.gmra.mrb[12].mxu0 %vm458_vm2, %v773_v20 }
 0x131   : > { %1965 = vmatmul.mubr.msk.bf16.vlgmr.msra.gmra.mrb[0].mxu1 %vm458_vm2, %v511_v44 }
 0x132   : > { %1973 = vmatpush3.bf16.msra.mxu1 %v2155_v1  ;;  %1968 = vmatprep.mubr.msk.bf16.mxu1 %vm458_vm2, %v512_v55 }
 0x133   : > { %1982 = vmatprep.subr.bf16.mxu1 %v2156_v6 }
 0x139   : > { %1969 = vmatmul.mubr.msk.bf16.gmra.mrb[4].mxu1 %vm458_vm2, %v1172_v21 }
 0x13a   : > { %1974 = vmatprep.mubr.msk.bf16.mxu1 %vm458_vm2, %v2438_v62  ;;  %v1351_v62 = vrot.slane %v508_v22, 2 }
 0x141   : > { %1975 = vmatmul.mubr.msk.bf16.vlgmr.msra.gmra.mrb[0].mxu1 %vm458_vm2, %v2476_v10  ;;  %v1352_v10 = vsel %vm737_vm5, %v1350_v17, %v1351_v62 }
 0x142   : > { %1983 = vmatpush3.bf16.msra.mxu1 %v2156_v6  ;;  %1978 = vmatprep.mubr.msk.bf16.mxu1 %vm458_vm2, %v2485_v29  ;;  %v1354_v30 = vpack.c.bf16 %v1352_v10, %v1072_v9  ;;  %v2157_v29 = vld [vmem:[%s2673_s5] sm:$0xff]  }
 0x143   : > { %1992 = vmatprep.subr.bf16.mxu0 %v2157_v29  ;;  %v1814_v6 = vld [vmem:[%s2674_s6] ss:$0 sm:$0xff] }
 0x144   : > { %1993 = vmatpush3.bf16.msra.mxu0 %v2157_v29  ;;  %v2026_v21 = vadd.f32 %v1820_v7, %v1814_v6 }
 0x145   : > { %2101 = vmatprep.subr.msk.bf16.mxu0 %vm381_vm0, %v1559_v31 }
 0x149   : > { %1979 = vmatmul.mubr.msk.bf16.gmra.mrb[4].mxu1 %vm458_vm2, %v1264_v28 }
 0x14a   : > { %1984 = vmatprep.mubr.msk.bf16.mxu1 %vm458_vm2, %v771_v13 }
 0x151   : > { %1985 = vmatmul.mubr.msk.bf16.vlgmr.msra.gmra.mrb[0].mxu1 %vm458_vm2, %v772_v14 }
 0x152   : > { %1988 = vmatprep.mubr.msk.bf16.mxu1 %vm458_vm2, %v773_v20 }
 0x159   : > { %1989 = vmatmul.mubr.msk.bf16.gmra.mrb[4].mxu1 %vm458_vm2, %v1354_v30 }
 0x1f6   : > { %v1926_v32 = vpop.f32.mrb[8].mxu0 }
 0x1f7   : > { %v829_v33 = vpop.f32.mrb[9].mxu0 }
 0x1f8   : > { %v1927_v34 = vpop.f32.mrb[10].mxu0 }
 0x1f9   : > { %v832_v35 = vpop.f32.mrb[11].mxu0 }
 0x1fe   : > { %v1930_v36 = vpop.f32.mrb[12].mxu0 }
 0x1ff   : > { %v845_v37 = vpop.f32.mrb[13].mxu0 }
 0x200   : > { %v1931_v40 = vpop.f32.mrb[14].mxu0 }
 0x201   : > { %v848_v42 = vpop.f32.mrb[15].mxu0 }
 0x224   : > { %v1986_v44 = vpop.f32.mrb[0].mxu1 }
 0x225   : > { %v2012_v46 = vadd.f32 %v1986_v44, %v1926_v32  ;;  %v1401_v47 = vpop.f32.mrb[1].mxu1 }
 0x226   : > { %v2013_v48 = vadd.f32 %v1401_v47, %v829_v33  ;;  %v1987_v49 = vpop.f32.mrb[2].mxu1 }
 0x227   : > { %v1449_v50 = vadd.f32 %v2012_v46, %v1813_v45  ;;  %v2014_v41 = vadd.f32 %v1987_v49, %v1927_v34  ;;  %v1404_v52 = vpop.f32.mrb[3].mxu1 }
 0x228   : > { %v1447_v43 = vadd.f32 %v2013_v48, %v1813_v45  ;;  %v2015_v25 = vadd.f32 %v1404_v52, %v832_v35 }
 0x229   : > { %v1450_v26 = vadd.f32 %v2014_v41, %v1813_v45  ;;  %v1457_v55 = vmax.f32 %v1449_v50, 0.0 }
 0x22a   : > { %v1448_v53 = vadd.f32 %v2015_v25, %v1813_v45  ;;  %v1455_v57 = vmax.f32 %v1447_v43, 0.0 }
 0x22b   : > { %v1458_v56 = vmax.f32 %v1450_v26, 0.0 }
 0x22c   : > { %v1456_v58 = vmax.f32 %v1448_v53, 0.0  ;;  %v1990_v59 = vpop.f32.mrb[4].mxu1 }
 0x22d   : > { %v1464_v60 = vpack.c.bf16 %v1458_v56, %v1457_v55  ;;  %v2016_v51 = vadd.f32 %v1990_v59, %v1930_v36  ;;  %v1417_v54 = vpop.f32.mrb[5].mxu1 }
 0x22e   : > { %v1463_v61 = vpack.c.bf16 %v1456_v58, %v1455_v57  ;;  %v2017_v63 = vadd.f32 %v1417_v54, %v845_v37  ;;  %v1991_v0 = vpop.f32.mrb[6].mxu1 }
 0x22f   : > { %v1453_v38 = vadd.f32 %v2016_v51, %v1813_v45  ;;  %v2018_v39 = vadd.f32 %v1991_v0, %v1931_v40  ;;  %v1420_v1 = vpop.f32.mrb[7].mxu1 }
 0x230   : > { %v1451_v8 = vadd.f32 %v2017_v63, %v1813_v45  ;;  %v2019_v11 = vadd.f32 %v1420_v1, %v848_v42  ;;  %1994 = vmatprep.mubr.msk.bf16.mxu0 %vm458_vm2, %v1463_v61 }
 0x231   : > { %v1454_v13 = vadd.f32 %v2018_v39, %v1813_v45  ;;  %1995 = vmatmul.mubr.msk.bf16.vlgmr.msra.gmra.mrb[16].mxu0 %vm458_vm2, %v1464_v60  ;;  %v1461_v15 = vmax.f32 %v1453_v38, 0.0 }
 0x232   : > { %v1452_v14 = vadd.f32 %v2019_v11, %v1813_v45  ;;  %2003 = vmatpush3.bf16.msra.mxu0 %v1568_v12  ;;  %v1459_v9 = vmax.f32 %v1451_v8, 0.0 }
 0x233   : > { %v1462_v16 = vmax.f32 %v1454_v13, 0.0 }
 0x234   : > { %v1460_v18 = vmax.f32 %v1452_v14, 0.0 }
 0x235   : > { %v1466_v19 = vpack.c.bf16 %v1462_v16, %v1461_v15 }
 0x236   : > { %v1465_v20 = vpack.c.bf16 %v1460_v18, %v1459_v9 }
 0x238   : > { %1998 = vmatprep.mubr.msk.bf16.mxu0 %vm458_vm2, %v1465_v20 }
 0x239   : > { %1999 = vmatmul.mubr.msk.bf16.gmra.mrb[20].mxu0 %vm458_vm2, %v1466_v19 }
 0x23a   : > { %2004 = vmatprep.mubr.msk.bf16.mxu0 %vm368_vm1, %v2334_v2 }
 0x241   : > { %2005 = vmatmul.mubr.msk.bf16.vlgmr.msra.gmra.mrb[16].mxu0 %vm368_vm1, %v2336_v3 }
 0x242   : > { %2008 = vmatprep.mubr.msk.bf16.mxu0 %vm368_vm1, %v2340_v4 }
 0x249   : > { %2009 = vmatmul.mubr.msk.bf16.gmra.mrb[20].mxu0 %vm368_vm1, %v2346_v5 }
 0x314   : > { %v2006_v2 = vpop.f32.mrb[16].mxu0 }
 0x315   : > { %v2020_v3 = vadd.f32 %v2006_v2, %v1814_v6  ;;  %v1604_v22 = vpop.f32.mrb[17].mxu0 }
 0x316   : > { %v2022_v23 = vadd.f32 %v1814_v6, %v1604_v22  ;;  %v2007_v4 = vpop.f32.mrb[18].mxu0 }
 0x317   : > { %v2021_v24 = vadd.f32 %v2020_v3, %v1820_v7  ;;  %v2025_v27 = vadd.f32 %v2026_v21, %v2007_v4  ;;  %v1607_v5 = vpop.f32.mrb[19].mxu0 }
 0x318   : > { %v2023_v28 = vadd.f32 %v2022_v23, %v1820_v7  ;;  %v2027_v17 = vadd.f32 %v2026_v21, %v1607_v5 }
 0x319   : > { %v1645_v62 = vmax.f32 %v2021_v24, 0.0  ;;  %v1646_v10 = vmax.f32 %v2025_v27, 0.0 }
 0x31a   : > { %v1643_v30 = vmax.f32 %v2023_v28, 0.0  ;;  %v1644_v29 = vmax.f32 %v2027_v17, 0.0 }
 0x31b   : > { %1654 = vst.msk [vmem:[%s325_s24 + $0x10] sm:$0xff] %vm1651_vm6, %v1645_v62  ;;  %1655 = vst.msk [vmem:[%s325_s24 + $0x18] sm:$0xff] %vm1651_vm6, %v1646_v10 }
 0x31c   : > { %1652 = vst.msk [vmem:[%s325_s24] sm:$0xff] %vm1651_vm6, %v1643_v30  ;;  %1653 = vst.msk [vmem:[%s325_s24 + $0x8] sm:$0xff] %vm1651_vm6, %v1644_v29  ;;  %v2010_v31 = vpop.f32.mrb[20].mxu0 }
 0x31d   : > { %v2029_v32 = vadd.f32 %v2026_v21, %v2010_v31  ;;  %v1620_v33 = vpop.f32.mrb[21].mxu0 }
 0x31e   : > { %v2031_v34 = vadd.f32 %v2026_v21, %v1620_v33  ;;  %v2011_v35 = vpop.f32.mrb[22].mxu0 }
 0x31f   : > { %v1649_v36 = vmax.f32 %v2029_v32, 0.0  ;;  %v2033_v37 = vadd.f32 %v2026_v21, %v2011_v35  ;;  %v1623_v40 = vpop.f32.mrb[23].mxu0 }
 0x320   : > { %v1647_v42 = vmax.f32 %v2031_v34, 0.0  ;;  %v2035_v44 = vadd.f32 %v2026_v21, %v1623_v40 }
 0x321   : > { %1658 = vst.msk [vmem:[%s325_s24 + $0x30] sm:$0xff] %vm1651_vm6, %v1649_v36  ;;  %v1650_v45 = vmax.f32 %v2033_v37, 0.0 }
 0x322   : > { %1656 = vst.msk [vmem:[%s325_s24 + $0x20] sm:$0xff] %vm1651_vm6, %v1647_v42  ;;  %v1648_v46 = vmax.f32 %v2035_v44, 0.0 }
 0x323   : > { %1659 = vst.msk [vmem:[%s325_s24 + $0x38] sm:$0xff] %vm1651_vm6, %v1650_v45 }
 0x324   : > { %1657 = vst.msk [vmem:[%s325_s24 + $0x28] sm:$0xff] %vm1651_vm6, %v1648_v46 }
 0x325   : > { %2171 = shalt.err (!%p2168_p3)
}
 0x326   : > { %s2172_s22 = scalar_lea.hbm %s2618_s29, 1024  ;;  %s2176_s25 = scalar_lea.hbm %s2677_s9, 2048 }
 0x327   : > { %p2173_p4 = scmp.ne.s32.totalorder %s2618_s29, %s2172_s22  ;;  %p2177_p9 = scmp.lt.u32.totalorder %s2618_s29, %s2677_s9 }
 0x328   : > { %p2178_p10 = scmp.lt.u32.totalorder %s2176_s25, %s2172_s22  ;;  %p2180_p12 = scmp.lt.u32.totalorder %s2172_s22, %s2618_s29 }
 0x329   : > { %p2174_p7 = pnand %p2173_p4, %p2314_p5 }
 0x32a   : > { %p2179_p11 = por %p2178_p10, %p2177_p9 }
 0x32b   : > { %p2175_p8 = pneg %p2174_p7 }
 0x32c   : > { %p2181_p13 = por %p2180_p12, %p2179_p11 }
 0x32e   : > { %p2182_p0 = pnand %p2181_p13, %p2175_p8 }
 0x330   : > { %2185 = shalt.err (!%p2182_p0)
}
 0x331   : > { %s2224_s14 = smov 128   ;;  %s2225_s16 = smov 8  }
 0x332   : > { %2102 = dma.vmem_to_hbm [thread:$0]  (%p2314_p5), %s2620_s26, 1024, %s2618_s29, %s2627_s13, %s2224_s14, %s2224_s14, %s2225_s16  }
 0x333 PF: > { %p2108_p1 = scmp.ge.s32.totalorder %s2220_s12, 2  ;;  %s1689_s17 = sand.u32 1, %s2208_s30  }
 0x334   : > { %s1690_s21 = scalar_lea.sflag [#allocation4], %s1689_s17 }
 0x335   : > { %p2105_p2 = pnand %p2108_p1, %p2318_p6 }
 0x337   : > { %2203 = dma.done.wait (!%p2105_p2), %s1690_s21, 1024  }
 0x338   : > { %2205 = vsyncadd (!%p2105_p2), %s1690_s21, 4294966272  ;;  %p19_p3 = scmp.ge.s32.totalorder %s2301_s15, 4   ;;  %s2680_s30 = smov %s2212_s10 }
 0x339   : > { %s2681_s10 = smov %s2216_s11  ;;  %s2682_s11 = smov %s2312_s18 }
 0x33a   : > { %s2683_s12 = smov %s2301_s15  ;;  %21 = sbr.rel (!%p19_p3) target bundleno = 3 (0x3), region = 100 }
 0x341   :  { %1695 = vsyncpa [#allocation4], 1 }
 0x342   :  { %1697 = vsyncpa [#allocation4 + $0x1], 1 }

</bundles_post_ra>
